<compile_context>
chip_gen: v5e
topology: v5e:2x2
jax: 0.10.0
libtpu: 0.0.40
codegen_flags: <defaults>
</compile_context>

<pallas_src>
import jax
import jax.numpy as jnp
from jax import lax
from jax.experimental import pallas as pl
from jax.experimental.pallas import tpu as pltpu


def _round_up(x, m):
    return ((x + m - 1) // m) * m


def decoder_kernel(x_ref, w_ref, b_ref, o_ref):
    # x_ref: (TB, Fp)   w_ref: (Cp, Fp)   b_ref: (1, Cp) f32   o_ref: (TB, Cp)
    acc = lax.dot_general(
        x_ref[...], w_ref[...],
        dimension_numbers=(((1,), (1,)), ((), ())),   # contract F on both sides
        preferred_element_type=jnp.float32)
    o_ref[...] = (acc + b_ref[...]).astype(o_ref.dtype)


def resnet_decoder(x, weight, bias, *, block_b=256, compute_dtype=None):
    """Forward pass of ResnetDecoder: out = flatten(x) @ weight.T + bias.

    x:      (B, ...)               -- flattened to (B, F)
    weight: (n_classes, F)         -- PyTorch nn.Linear layout (NOT transposed)
    bias:   (n_classes,)
    compute_dtype: optional cast for x / weight (e.g. jnp.bfloat16); accumulation
                   and bias add remain f32.
    returns (B, n_classes) in x.dtype
    """
    B = x.shape[0]
    x_flat = x.reshape(B, -1)
    F_ = x_flat.shape[1]
    C = weight.shape[0]
    assert weight.shape[1] == F_, "in_features mismatch"

    out_dtype = x.dtype
    if compute_dtype is not None:
        x_flat = x_flat.astype(compute_dtype)
        weight = weight.astype(compute_dtype)

    in_itemsize = jnp.dtype(x_flat.dtype).itemsize
    out_itemsize = jnp.dtype(out_dtype).itemsize
    sublane = 8 if in_itemsize >= 4 else (16 if in_itemsize == 2 else 32)

    # Lane-aligned (128) padding of F and n_classes; sublane-aligned batch tile.
    Fp = _round_up(F_, 128)
    Cp = _round_up(C, 128)
    TB = _round_up(min(block_b, _round_up(B, sublane)), sublane)
    Bp = _round_up(B, TB)

    x_p = jnp.pad(x_flat, ((0, Bp - B), (0, Fp - F_)))
    w_p = jnp.pad(weight, ((0, Cp - C), (0, Fp - F_)))
    b_p = jnp.pad(bias.astype(jnp.float32), (0, Cp - C)).reshape(1, Cp)

    grid = (Bp // TB,)

    # VMEM budget: double-buffered x / out tiles + resident weight + bias.
    vmem_bytes = (2 * TB * Fp * in_itemsize
                  + 2 * Cp * Fp * in_itemsize
                  + 2 * TB * Cp * out_itemsize
                  + 2 * Cp * 4)
    vmem_limit = int(min(max(vmem_bytes + (4 << 20), 16 << 20), 100 << 20))

    cost = pl.CostEstimate(
        flops=2 * Bp * Fp * Cp,
        transcendentals=0,
        bytes_accessed=(Bp * Fp + Cp * Fp) * in_itemsize
                       + Cp * 4 + Bp * Cp * out_itemsize)

    out_p = pl.pallas_call(
        decoder_kernel,
        out_shape=jax.ShapeDtypeStruct((Bp, Cp), out_dtype),
        grid=grid,
        in_specs=[
            pl.BlockSpec((TB, Fp), lambda i: (i, 0)),   # activation tile, pipelined
            pl.BlockSpec((Cp, Fp), lambda i: (0, 0)),   # weight: resident in VMEM
            pl.BlockSpec((1, Cp), lambda i: (0, 0)),    # bias: resident in VMEM
        ],
        out_specs=pl.BlockSpec((TB, Cp), lambda i: (i, 0)),
        compiler_params=pltpu.CompilerParams(
            dimension_semantics=("parallel",),          # megacore sharding (v7x)
            vmem_limit_bytes=vmem_limit),
        cost_estimate=cost,
    )(x_p, w_p, b_p)

    # TODO(synk): for very large F (>~16K) add a K-reduction grid axis with a
    # (TB, Cp) f32 accumulator scratch; standard ResNet heads (F<=2048) fit as-is.
    return out_p[:B, :C]


if __name__ == "__main__":
    # Small shapes consistent with the module: ResNet feature map flattened.
    B, C_in, H, W = 2, 4, 4, 2          # -> in_features = 32
    in_features = C_in * H * W
    n_classes = 10

    key = jax.random.PRNGKey(0)
    kx, kw, kb = jax.random.split(key, 3)

    x = jax.random.normal(kx, (B, C_in, H, W), dtype=jnp.float32)
    weight = jax.random.normal(kw, (n_classes, in_features), dtype=jnp.float32) * 0.05
    bias = jax.random.normal(kb, (n_classes,), dtype=jnp.float32) * 0.05

    # f32 path (exact check against the pure-JAX reference).
    out = resnet_decoder(x, weight, bias)
    out = jax.block_until_ready(out)

    ref = x.reshape(B, -1) @ weight.T + bias
    assert out.shape == (B, n_classes)
    assert jnp.allclose(out, ref, atol=1e-5, rtol=1e-5)

    # bf16 compute path (halves HBM traffic; loose tolerance vs f32 reference).
    out_bf16 = resnet_decoder(x, weight, bias, compute_dtype=jnp.bfloat16)
    out_bf16 = jax.block_until_ready(out_bf16)
    assert out_bf16.shape == (B, n_classes)
    assert jnp.allclose(out_bf16, ref, atol=1e-1, rtol=1e-1)

    print("KERNEL_OK")
</pallas_src>

<mosaic_0001>
module attributes {stable_mosaic.version = 11 : i64} {
  func.func @decoder_kernel(%arg0: i32, %arg1: memref<8x128xf32, #tpu.memory_space<vmem>>, %arg2: memref<128x128xf32, #tpu.memory_space<vmem>>, %arg3: memref<1x128xf32, #tpu.memory_space<vmem>>, %arg4: memref<8x128xf32, #tpu.memory_space<vmem>>) attributes {dimension_semantics = [#tpu.dimension_semantics<parallel>], iteration_bounds = array<i64: 1>, scalar_prefetch = 0 : i64, scratch_operands = 0 : i64, tpu.core_type = #tpu.core_type<tc>, window_params = [{transform_indices = @transform_0, window_bounds = array<i64: 8, 128>}, {pipeline_mode = #tpu.pipeline_mode<synchronous>, transform_indices = @transform_1, window_bounds = array<i64: 128, 128>}, {pipeline_mode = #tpu.pipeline_mode<synchronous>, transform_indices = @transform_2, window_bounds = array<i64: 1, 128>}, {transform_indices = @transform_3, window_bounds = array<i64: 8, 128>}]} {
    %c0 = arith.constant 0 : index
    %c0_0 = arith.constant 0 : index
    %0 = vector.load %arg1[%c0, %c0_0] : memref<8x128xf32, #tpu.memory_space<vmem>>, vector<8x128xf32>
    %c0_1 = arith.constant 0 : index
    %c0_2 = arith.constant 0 : index
    %1 = vector.load %arg2[%c0_1, %c0_2] : memref<128x128xf32, #tpu.memory_space<vmem>>, vector<128x128xf32>
    %cst = arith.constant dense<0.000000e+00> : vector<8x128xf32>
    %2 = tpu.matmul %0, %1, %cst {dimension_numbers = #tpu.dot_dimension_numbers<[1], [1], [0], [0], [0, 0, 1, 0], [], []>} : vector<8x128xf32>, vector<128x128xf32>, vector<8x128xf32> -> vector<8x128xf32>
    %c0_3 = arith.constant 0 : index
    %c0_4 = arith.constant 0 : index
    %3 = vector.load %arg3[%c0_3, %c0_4] : memref<1x128xf32, #tpu.memory_space<vmem>>, vector<1x128xf32>
    %4 = vector.broadcast %3 : vector<1x128xf32> to vector<8x128xf32>
    %5 = arith.addf %2, %4 : vector<8x128xf32>
    %c0_5 = arith.constant 0 : index
    %c0_6 = arith.constant 0 : index
    %6 = vector.load %arg4[%c0_5, %c0_6] : memref<8x128xf32, #tpu.memory_space<vmem>>, vector<8x128xf32>
    tpu.vector_store %arg4[%c0_5, %c0_6], %5 {strides = array<i32>} : memref<8x128xf32, #tpu.memory_space<vmem>>, vector<8x128xf32>,
    return
  }
  func.func @transform_0(%arg0: i32) -> (i32, i32) {
    %c0_i32 = arith.constant 0 : i32
    %c0_i32_0 = arith.constant 0 : i32
    return %arg0, %c0_i32 : i32, i32
  }
  func.func @transform_1(%arg0: i32) -> (i32, i32) {
    %c0_i32 = arith.constant 0 : i32
    %c0_i32_0 = arith.constant 0 : i32
    %c0_i32_1 = arith.constant 0 : i32
    return %c0_i32, %c0_i32_0 : i32, i32
  }
  func.func @transform_2(%arg0: i32) -> (i32, i32) {
    %c0_i32 = arith.constant 0 : i32
    %c0_i32_0 = arith.constant 0 : i32
    %c0_i32_1 = arith.constant 0 : i32
    return %c0_i32, %c0_i32_0 : i32, i32
  }
  func.func @transform_3(%arg0: i32) -> (i32, i32) {
    %c0_i32 = arith.constant 0 : i32
    %c0_i32_0 = arith.constant 0 : i32
    return %arg0, %c0_i32 : i32, i32
  }
}

</mosaic_0001>

<bundles_post_ra>
// kernel: tpu_custom_call.1
= control target key start
LH: loop header
LB: loop body
LE: loop exit
PB: predicated region body
PF: predicated region fallthrough
CT: control target
= control target key end

     0   :  { %8 = vsyncpa [#allocation3], 0  ;;  %s226_s0 = inlined_call_operand.hbm [shape: f32[8,128], index: 0, kind: input, shape index: {}]   ;;  %s227_s1 = inlined_call_operand.hbm [shape: f32[128,128], index: 1, kind: input, shape index: {}]   ;;  %s228_s2 = inlined_call_operand.vmem [shape: f32[1,128], index: 2, kind: input, shape index: {}]   ;;  %s229_s3 = inlined_call_operand.hbm [shape: f32[8,128], index: 3, kind: output, shape index: {}]  }
   0x1   :  { %9 = vsyncpa [#allocation6], 0 }
   0x2   :  { %10 = vsyncpa [#allocation4], 0  ;;  %s16_s14 = sshll.u32 %s226_s0, 4  ;;  %s189_s15 = smov [#allocation2]   ;;  %s17_s14 = int_to_ptr.hbm [resolvable:$true] %s16_s14 }
   0x3   :  { %s18_s16 = sshll.u32 %s189_s15, 4  ;;  %s26_s19 = sshll.u32 %s227_s1, 4  ;;  %s19_s16 = int_to_ptr.vmem [resolvable:$true] %s18_s16  ;;  %s27_s19 = int_to_ptr.hbm [resolvable:$true] %s26_s19 }
   0x4   :  { %21 = dma.hbm_to_vmem [thread:$0]  %s17_s14, 128, %s19_s16, [#allocation3]  }
   0x5   :  { %s190_s20 = smov [#allocation5]   ;;  %s191_s22 = smov 128  }
   0x6   :  { %s28_s21 = sshll.u32 %s190_s20, 4  ;;  %s192_s23 = smov 8   ;;  %s29_s21 = int_to_ptr.vmem [resolvable:$true] %s28_s21 }
   0x7   :  { %34 = dma.hbm_to_vmem [thread:$0]  %s27_s19, 2048, %s29_s21, [#allocation6], %s191_s22, %s191_s22, %s192_s23  }
   0x8   :  { %183 = dma.done.wait [#allocation3], 128  }
   0x9   :  { %184 = vsyncadd [#allocation3], 4294967168 }
   0xa   :  { %185 = dma.done.wait [#allocation6], 2048  }
   0xb   :  { %186 = vsyncadd [#allocation6], 4294965248  ;;  %v61_v0 = vld [vmem:[#allocation5 + $0x78] sm:$0xff]  ;;  %v60_v1 = vld [vmem:[#allocation5 + $0x70] sm:$0xff]  ;;  %s193_s24 = smov [#allocation7]   ;;  %s94_s28 = sshll.u32 %s229_s3, 4  ;;  %s95_s28 = int_to_ptr.hbm [resolvable:$true] %s94_s28 }
   0xc   :  { %66 = vmatpush.xpose.msra.mxu0 %v61_v0  ;;  %v59_v2 = vld [vmem:[#allocation5 + $0x68] sm:$0xff]  ;;  %v58_v3 = vld [vmem:[#allocation5 + $0x60] sm:$0xff]  ;;  %v57_v4 = vld [vmem:[#allocation5 + $0x58] sm:$0xff]  ;;  %s92_s25 = sshll.u32 %s193_s24, 4  ;;  %s93_s25 = int_to_ptr.vmem [resolvable:$true] %s92_s25 }
   0xd   :  { %v56_v5 = vld [vmem:[#allocation5 + $0x50] sm:$0xff]  ;;  %v55_v6 = vld [vmem:[#allocation5 + $0x48] sm:$0xff]  ;;  %v54_v7 = vld [vmem:[#allocation5 + $0x40] sm:$0xff] }
   0xe   :  { %v53_v8 = vld [vmem:[#allocation5 + $0x38] sm:$0xff]  ;;  %v52_v9 = vld [vmem:[#allocation5 + $0x30] sm:$0xff]  ;;  %v51_v10 = vld [vmem:[#allocation5 + $0x28] sm:$0xff] }
   0xf   :  { %v50_v11 = vld [vmem:[#allocation5 + $0x20] sm:$0xff]  ;;  %v49_v12 = vld [vmem:[#allocation5 + $0x18] sm:$0xff]  ;;  %v48_v13 = vld [vmem:[#allocation5 + $0x10] sm:$0xff] }
  0x10   :  { %67 = vmatpush.xpose.msra.mxu0 %v60_v1  ;;  %v47_v14 = vld [vmem:[#allocation5 + $0x8] sm:$0xff]  ;;  %v46_v15 = vld [vmem:[#allocation5] sm:$0xff]  ;;  %v45_v16 = vld [vmem:[#allocation2] sm:$0xff] }
  0x11   :  { %v110_v17 = vld [vmem:[%s228_s2] ss:$0 sm:$0xff] }
  0x14   :  { %68 = vmatpush.xpose.msra.mxu0 %v59_v2 }
  0x18   :  { %69 = vmatpush.xpose.msra.mxu0 %v58_v3 }
  0x1c   :  { %70 = vmatpush.xpose.msra.mxu0 %v57_v4 }
  0x20   :  { %71 = vmatpush.xpose.msra.mxu0 %v56_v5 }
  0x24   :  { %72 = vmatpush.xpose.msra.mxu0 %v55_v6 }
  0x28   :  { %73 = vmatpush.xpose.msra.mxu0 %v54_v7 }
  0x2c   :  { %74 = vmatpush.xpose.msra.mxu0 %v53_v8 }
  0x30   :  { %75 = vmatpush.xpose.msra.mxu0 %v52_v9 }
  0x34   :  { %76 = vmatpush.xpose.msra.mxu0 %v51_v10 }
  0x38   :  { %77 = vmatpush.xpose.msra.mxu0 %v50_v11 }
  0x3c   :  { %78 = vmatpush.xpose.msra.mxu0 %v49_v12 }
  0x40   :  { %79 = vmatpush.xpose.msra.mxu0 %v48_v13 }
  0x44   :  { %80 = vmatpush.xpose.msra.mxu0 %v47_v14 }
  0x48   :  { %81 = vmatpush.xpose.msra.mxu0 %v46_v15 }
  0x4b   :  { %82 = vmatmul.f32.vlgmr.msra.gmra.mxu0 %v45_v16 }
  0xc8   :  { %v83_v18 = vpop.f32.mrf.mxu0 }
  0xc9   :  { %v84_v19 = vadd.f32 %v110_v17, %v83_v18 }
  0xcb   :  { %86 = vst [vmem:[#allocation7] sm:$0xff] %v84_v19 }
  0xcc   :  { %97 = dma.vmem_to_hbm [thread:$0]  %s93_s25, 128, %s95_s28, [#allocation4]  }
  0xcd   :  { %187 = dma.done.wait [#allocation4], 128  }
  0xce   :  { %188 = vsyncadd [#allocation4], 4294967168 }
  0xcf   :  { %102 = vsyncpa [#allocation3], 1 }
  0xd0   :  { %103 = vsyncpa [#allocation6], 1 }
  0xd1   :  { %104 = vsyncpa [#allocation4], 1 }

</bundles_post_ra>
